<compile_context>
chip_gen: v6e
topology: v6e:2x2x1
jax: 0.10.0
libtpu: 0.0.40
codegen_flags: <defaults>
</compile_context>

<pallas_src>
import functools

import jax
import jax.numpy as jnp
from jax.experimental import pallas as pl
from jax.experimental.pallas import tpu as pltpu


def _round_up(x: int, m: int) -> int:
    return ((x + m - 1) // m) * m


def _generator_kernel(x_ref, w1_ref, b1_ref, w2_ref, b2_ref, o_ref):
    # Linear 1: cast x to the MXU operand dtype in-kernel (no-op on f32 path),
    # accumulate in f32 on the MXU.
    x = x_ref[...].astype(w1_ref.dtype)
    h = jnp.dot(x, w1_ref[...], preferred_element_type=jnp.float32)
    h = h + b1_ref[...].astype(jnp.float32)      # bias add in f32 (VPU)
    h = jnp.maximum(h, 0.01 * h)                 # LeakyReLU(0.01): mul + max

    # Linear 2: MXU with f32 accumulation, then Tanh on the EUP in f32.
    y = jnp.dot(h.astype(w2_ref.dtype), w2_ref[...],
                preferred_element_type=jnp.float32)
    y = y + b2_ref[...].astype(jnp.float32)
    o_ref[...] = jnp.tanh(y).astype(o_ref.dtype)


@functools.partial(jax.jit, static_argnames=("block_b", "out_dtype"))
def generator_forward(x, w1, b1, w2, b2, *, block_b=1024, out_dtype=None):
    """Fused 2-layer MLP forward. x: [B, input_dim] -> [B, out_dim]."""
    B, in_dim = x.shape
    hidden = w1.shape[1]
    out_dim = w2.shape[1]
    out_dtype = jnp.dtype(x.dtype if out_dtype is None else out_dtype)

    # ---- Batch tile: big enough to amortize per-step overhead, and chosen so
    # the 1-D grid splits ~evenly across 2 TensorCores (v7x) for moderate B.
    bb = max(8, min(block_b, _round_up(-(-B // 2), 8)))
    grid_b = pl.cdiv(B, bb)

    # ---- Cost estimate for the XLA scheduler (true HBM bytes, no pad/cast). -
    x_it = jnp.dtype(x.dtype).itemsize
    w1_it = jnp.dtype(w1.dtype).itemsize
    w2_it = jnp.dtype(w2.dtype).itemsize
    b1_it = jnp.dtype(b1.dtype).itemsize
    b2_it = jnp.dtype(b2.dtype).itemsize
    o_it = out_dtype.itemsize
    weight_bytes = (in_dim * hidden * w1_it + hidden * b1_it
                    + hidden * out_dim * w2_it + out_dim * b2_it)
    cost = pl.CostEstimate(
        flops=2 * B * (in_dim * hidden + hidden * out_dim),
        transcendentals=B * out_dim,
        bytes_accessed=B * in_dim * x_it + weight_bytes + B * out_dim * o_it,
    )

    # ---- VMEM limit derived from actual block footprint (safe on v7x 64MiB).
    footprint = (2 * bb * in_dim * x_it          # double-buffered x tiles
                 + 2 * bb * out_dim * o_it       # double-buffered out tiles
                 + 2 * weight_bytes)             # resident weights/biases
    vmem_limit = int(min(64 * 1024 * 1024,
                         max(32 * 1024 * 1024, 2 * footprint + (4 << 20))))

    return pl.pallas_call(
        _generator_kernel,
        out_shape=jax.ShapeDtypeStruct((B, out_dim), out_dtype),
        grid_spec=pltpu.PrefetchScalarGridSpec(
            num_scalar_prefetch=0,
            grid=(grid_b,),
            in_specs=[
                # x: tile over batch only; ragged tail handled as a partial
                # edge block (never stored for out-of-range rows).
                pl.BlockSpec((bb, in_dim), lambda i: (i, 0)),
                # Weights / biases: full arrays, same block every step (Pallas
                # skips the re-DMA when the block index is unchanged).
                pl.BlockSpec((in_dim, hidden), lambda i: (0, 0)),
                pl.BlockSpec((1, hidden), lambda i: (0, 0)),
                pl.BlockSpec((hidden, out_dim), lambda i: (0, 0)),
                pl.BlockSpec((1, out_dim), lambda i: (0, 0)),
            ],
            out_specs=pl.BlockSpec((bb, out_dim), lambda i: (i, 0)),
        ),
        compiler_params=pltpu.CompilerParams(
            dimension_semantics=("parallel",),   # megacore-shard the batch
            vmem_limit_bytes=vmem_limit,
        ),
        cost_estimate=cost,
    )(x, w1, b1, w2, b2)


def init_generator_params(key, input_dim, out_dim, hidden=256,
                          dtype=jnp.float32):
    """PyTorch-style uniform(-1/sqrt(fan_in), 1/sqrt(fan_in)) init."""
    k1, k2, k3, k4 = jax.random.split(key, 4)
    lim1 = 1.0 / (input_dim ** 0.5)
    lim2 = 1.0 / (hidden ** 0.5)
    # Stored as [in, out] (transposed vs. torch's [out, in]); semantics match.
    w1 = jax.random.uniform(k1, (input_dim, hidden), dtype, -lim1, lim1)
    b1 = jax.random.uniform(k2, (1, hidden), dtype, -lim1, lim1)
    w2 = jax.random.uniform(k3, (hidden, out_dim), dtype, -lim2, lim2)
    b2 = jax.random.uniform(k4, (1, out_dim), dtype, -lim2, lim2)
    return w1, b1, w2, b2


def prepare_generator_params(w1, b1, w2, b2, compute_dtype=jnp.bfloat16):
    """One-time cast of the MXU operands (weights) to compute_dtype; biases
    stay f32. Call once outside the training/inference step so the per-call
    graph contains only the pallas_call."""
    return (w1.astype(compute_dtype), b1.astype(jnp.float32),
            w2.astype(compute_dtype), b2.astype(jnp.float32))


def _reference_forward(x, w1, b1, w2, b2):
    h = x @ w1 + b1
    h = jnp.where(h > 0, h, 0.01 * h)
    return jnp.tanh(h @ w2 + b2)


if __name__ == "__main__":
    key = jax.random.PRNGKey(0)
    kx, kp, kx2 = jax.random.split(key, 3)

    batch, input_dim, out_dim = 8, 32, 64
    x = jax.random.normal(kx, (batch, input_dim), jnp.float32)
    w1, b1, w2, b2 = init_generator_params(kp, input_dim, out_dim)
    ref = _reference_forward(x, w1, b1, w2, b2)

    # 1) f32 path (weights as-is): tight check against the reference.
    out_f32 = jax.block_until_ready(generator_forward(x, w1, b1, w2, b2))
    assert out_f32.shape == (batch, out_dim)
    assert jnp.allclose(out_f32, ref, atol=1e-5, rtol=1e-5), \
        "f32 path mismatch vs reference"

    # 2) Fast path: bf16 MXU operands (cast once), f32 accumulation/elementwise.
    params_bf16 = prepare_generator_params(w1, b1, w2, b2, jnp.bfloat16)
    out_bf16 = jax.block_until_ready(generator_forward(x, *params_bf16))
    assert out_bf16.shape == (batch, out_dim)
    assert jnp.allclose(out_bf16, ref, atol=3e-2, rtol=3e-2), \
        "bf16-operand path mismatch vs f32 reference"

    # 3) Non-divisible batch exercises the ragged edge-block path (no jnp.pad).
    x_odd = jax.random.normal(kx2, (13, input_dim), jnp.float32)
    out_odd = jax.block_until_ready(generator_forward(x_odd, w1, b1, w2, b2))
    ref_odd = _reference_forward(x_odd, w1, b1, w2, b2)
    assert out_odd.shape == (13, out_dim)
    assert jnp.allclose(out_odd, ref_odd, atol=1e-5, rtol=1e-5), \
        "non-divisible-batch path mismatch vs reference"

    print("KERNEL_OK")
</pallas_src>

<mosaic_0001>
module attributes {stable_mosaic.version = 11 : i64} {
  func.func @_generator_kernel(%arg0: i32, %arg1: memref<8x32xf32, #tpu.memory_space<vmem>>, %arg2: memref<32x256xf32, #tpu.memory_space<vmem>>, %arg3: memref<1x256xf32, #tpu.memory_space<vmem>>, %arg4: memref<256x64xf32, #tpu.memory_space<vmem>>, %arg5: memref<1x64xf32, #tpu.memory_space<vmem>>, %arg6: memref<8x64xf32, #tpu.memory_space<vmem>>) attributes {dimension_semantics = [#tpu.dimension_semantics<parallel>], iteration_bounds = array<i64: 1>, scalar_prefetch = 0 : i64, scratch_operands = 0 : i64, tpu.core_type = #tpu.core_type<tc>, window_params = [{transform_indices = @transform_0, window_bounds = array<i64: 8, 32>}, {pipeline_mode = #tpu.pipeline_mode<synchronous>, transform_indices = @transform_1, window_bounds = array<i64: 32, 256>}, {pipeline_mode = #tpu.pipeline_mode<synchronous>, transform_indices = @transform_2, window_bounds = array<i64: 1, 256>}, {pipeline_mode = #tpu.pipeline_mode<synchronous>, transform_indices = @transform_3, window_bounds = array<i64: 256, 64>}, {pipeline_mode = #tpu.pipeline_mode<synchronous>, transform_indices = @transform_4, window_bounds = array<i64: 1, 64>}, {transform_indices = @transform_5, window_bounds = array<i64: 8, 64>}]} {
    %c0 = arith.constant 0 : index
    %c0_0 = arith.constant 0 : index
    %0 = vector.load %arg1[%c0, %c0_0] : memref<8x32xf32, #tpu.memory_space<vmem>>, vector<8x32xf32>
    %c0_1 = arith.constant 0 : index
    %c0_2 = arith.constant 0 : index
    %1 = vector.load %arg2[%c0_1, %c0_2] : memref<32x256xf32, #tpu.memory_space<vmem>>, vector<32x256xf32>
    %cst = arith.constant dense<0.000000e+00> : vector<8x256xf32>
    %2 = tpu.matmul %0, %1, %cst {dimension_numbers = #tpu.dot_dimension_numbers<[1], [0], [0], [1], [0, 0, 1, 1], [], []>} : vector<8x32xf32>, vector<32x256xf32>, vector<8x256xf32> -> vector<8x256xf32>
    %c0_3 = arith.constant 0 : index
    %c0_4 = arith.constant 0 : index
    %3 = vector.load %arg3[%c0_3, %c0_4] : memref<1x256xf32, #tpu.memory_space<vmem>>, vector<1x256xf32>
    %4 = vector.broadcast %3 : vector<1x256xf32> to vector<8x256xf32>
    %5 = arith.addf %2, %4 : vector<8x256xf32>
    %cst_5 = arith.constant 0.00999999977 : f32
    %6 = vector.broadcast %cst_5 : f32 to vector<8x256xf32>
    %7 = arith.mulf %6, %5 : vector<8x256xf32>
    %8 = arith.maximumf %5, %7 : vector<8x256xf32>
    %c0_6 = arith.constant 0 : index
    %c0_7 = arith.constant 0 : index
    %9 = vector.load %arg4[%c0_6, %c0_7] : memref<256x64xf32, #tpu.memory_space<vmem>>, vector<256x64xf32>
    %cst_8 = arith.constant dense<0.000000e+00> : vector<8x64xf32>
    %10 = tpu.matmul %8, %9, %cst_8 {dimension_numbers = #tpu.dot_dimension_numbers<[1], [0], [0], [1], [0, 0, 1, 1], [], []>} : vector<8x256xf32>, vector<256x64xf32>, vector<8x64xf32> -> vector<8x64xf32>
    %c0_9 = arith.constant 0 : index
    %c0_10 = arith.constant 0 : index
    %11 = vector.load %arg5[%c0_9, %c0_10] : memref<1x64xf32, #tpu.memory_space<vmem>>, vector<1x64xf32>
    %12 = vector.broadcast %11 : vector<1x64xf32> to vector<8x64xf32>
    %13 = arith.addf %10, %12 : vector<8x64xf32>
    %14 = math.tanh %13 : vector<8x64xf32>
    %c0_11 = arith.constant 0 : index
    %c0_12 = arith.constant 0 : index
    %15 = vector.load %arg6[%c0_11, %c0_12] : memref<8x64xf32, #tpu.memory_space<vmem>>, vector<8x64xf32>
    tpu.vector_store %arg6[%c0_11, %c0_12], %14 {strides = array<i32>} : memref<8x64xf32, #tpu.memory_space<vmem>>, vector<8x64xf32>,
    return
  }
  func.func @transform_0(%arg0: i32) -> (i32, i32) {
    %c0_i32 = arith.constant 0 : i32
    %c0_i32_0 = arith.constant 0 : i32
    return %arg0, %c0_i32 : i32, i32
  }
  func.func @transform_1(%arg0: i32) -> (i32, i32) {
    %c0_i32 = arith.constant 0 : i32
    %c0_i32_0 = arith.constant 0 : i32
    %c0_i32_1 = arith.constant 0 : i32
    return %c0_i32, %c0_i32_0 : i32, i32
  }
  func.func @transform_2(%arg0: i32) -> (i32, i32) {
    %c0_i32 = arith.constant 0 : i32
    %c0_i32_0 = arith.constant 0 : i32
    %c0_i32_1 = arith.constant 0 : i32
    return %c0_i32, %c0_i32_0 : i32, i32
  }
  func.func @transform_3(%arg0: i32) -> (i32, i32) {
    %c0_i32 = arith.constant 0 : i32
    %c0_i32_0 = arith.constant 0 : i32
    %c0_i32_1 = arith.constant 0 : i32
    return %c0_i32, %c0_i32_0 : i32, i32
  }
  func.func @transform_4(%arg0: i32) -> (i32, i32) {
    %c0_i32 = arith.constant 0 : i32
    %c0_i32_0 = arith.constant 0 : i32
    %c0_i32_1 = arith.constant 0 : i32
    return %c0_i32, %c0_i32_0 : i32, i32
  }
  func.func @transform_5(%arg0: i32) -> (i32, i32) {
    %c0_i32 = arith.constant 0 : i32
    %c0_i32_0 = arith.constant 0 : i32
    return %arg0, %c0_i32 : i32, i32
  }
}

</mosaic_0001>

<bundles_post_ra>
// kernel: generator_forward.1
= control target key start
LH: loop header
LB: loop body
LE: loop exit
PB: predicated region body
PF: predicated region fallthrough
CT: control target
= control target key end

     0   :  { %v310_v4 = vmov 0.0   ;;  %vm42_vm0 = vcmask 261120   ;;  %s474_s0 = inlined_call_operand.vmem [shape: f32[8,32], index: 0, kind: input, shape index: {}]   ;;  %s475_s1 = inlined_call_operand.vmem [shape: f32[32,256], index: 1, kind: input, shape index: {}]   ;;  %s476_s2 = inlined_call_operand.vmem [shape: f32[1,256], index: 2, kind: input, shape index: {}]   ;;  %s477_s3 = inlined_call_operand.vmem [shape: f32[256,64], index: 3, kind: input, shape index: {}]   ;;  %s478_s4 = inlined_call_operand.vmem [shape: f32[1,64], index: 4, kind: input, shape index: {}]   ;;  %s479_s5 = inlined_call_operand.hbm [shape: f32[8,64], index: 5, kind: output, shape index: {}]  }
   0x1   :  { %v29_v0 = vld [vmem:[%s475_s1 + $0x38] sm:$0xff]  ;;  %v28_v1 = vld [vmem:[%s475_s1 + $0x30] sm:$0xff]  ;;  %v27_v2 = vld [vmem:[%s475_s1 + $0x28] sm:$0xff]  ;;  %110 = vmatprep.mubr.f32.mxu0 %v310_v4 }
   0x2   :  { %70 = vmatprep.subr.mxu0 %v29_v0  ;;  %v26_v3 = vld [vmem:[%s475_s1 + $0x20] sm:$0xff]  ;;  %v25_v5 = vld [vmem:[%s475_s1 + $0x18] sm:$0xff]  ;;  %v24_v6 = vld [vmem:[%s475_s1 + $0x10] sm:$0xff] }
   0x3   :  { %71 = vmatpush1.msra.mxu0 %v28_v1  ;;  %v152_v7 = vld [vmem:[%s477_s3 + $0xf8] sm:$0xff]  ;;  %v151_v9 = vld [vmem:[%s477_s3 + $0xf0] sm:$0xff]  ;;  %v23_v10 = vld [vmem:[%s475_s1 + $0x8] sm:$0xff] }
   0x4   :  { %72 = vmatprep.subr.mxu0 %v27_v2  ;;  %v136_v8 = vld [vmem:[%s477_s3 + $0x78] sm:$0xff]  ;;  %249 = vmatprep.subr.mxu1 %v152_v7  ;;  %v135_v11 = vld [vmem:[%s477_s3 + $0x70] sm:$0xff]  ;;  %v22_v12 = vld [vmem:[%s475_s1] sm:$0xff] }
   0x5   :  { %73 = vmatpush1.msra.mxu0 %v26_v3  ;;  %250 = vmatpush3.msra.mxu1 %v136_v8  ;;  %v150_v13 = vld [vmem:[%s477_s3 + $0xe8] sm:$0xff]  ;;  %v21_v14 = vld [vmem:[%s474_s0] sm:$0xff]  ;;  %v148_v18 = vld [vmem:[%s477_s3 + $0xd8] sm:$0xff] }
   0x6   :  { %74 = vmatprep.subr.mxu0 %v25_v5  ;;  %251 = vmatprep.subr.mxu1 %v151_v9  ;;  %v134_v15 = vld [vmem:[%s477_s3 + $0x68] sm:$0xff]  ;;  %v149_v16 = vld [vmem:[%s477_s3 + $0xe0] sm:$0xff]  ;;  %v132_v19 = vld [vmem:[%s477_s3 + $0x58] sm:$0xff] }
   0x7   :  { %75 = vmatpush1.msra.mxu0 %v24_v6  ;;  %252 = vmatpush3.msra.mxu1 %v135_v11  ;;  %v133_v17 = vld [vmem:[%s477_s3 + $0x60] sm:$0xff] }
   0x8   :  { %76 = vmatprep.subr.mxu0 %v23_v10  ;;  %253 = vmatprep.subr.mxu1 %v150_v13 }
   0x9   :  { %77 = vmatpush1.msra.mxu0 %v22_v12  ;;  %254 = vmatpush3.msra.mxu1 %v134_v15 }
   0xa   :  { %247 = vmatmul.mubr.msk.f32.vlgmr.msra.gmra.mxu0 %vm42_vm0, %v21_v14  ;;  %255 = vmatprep.subr.mxu1 %v149_v16 }
   0xb   :  { %10 = vsyncpa [#allocation3], 0  ;;  %256 = vmatpush3.msra.mxu1 %v133_v17  ;;  %v147_v20 = vld [vmem:[%s477_s3 + $0xd0] sm:$0xff]  ;;  %v146_v22 = vld [vmem:[%s477_s3 + $0xc8] sm:$0xff]  ;;  %v32_v42 = vlaneseq  ;;  %vm231_vm1 = vcmask 523264  }
   0xc   :  { %257 = vmatprep.subr.mxu1 %v148_v18  ;;  %v131_v21 = vld [vmem:[%s477_s3 + $0x50] sm:$0xff]  ;;  %v130_v23 = vld [vmem:[%s477_s3 + $0x48] sm:$0xff]  ;;  %v145_v24 = vld [vmem:[%s477_s3 + $0xc0] sm:$0xff] }
   0xd   :  { %258 = vmatpush3.msra.mxu1 %v132_v19  ;;  %v129_v25 = vld [vmem:[%s477_s3 + $0x40] sm:$0xff]  ;;  %v144_v26 = vld [vmem:[%s477_s3 + $0xb8] sm:$0xff]  ;;  %v143_v28 = vld [vmem:[%s477_s3 + $0xb0] sm:$0xff]  ;;  %v33_v43 = vshrl.u32 %v32_v42, 7 }
   0xe   :  { %259 = vmatprep.subr.mxu1 %v147_v20  ;;  %v128_v27 = vld [vmem:[%s477_s3 + $0x38] sm:$0xff]  ;;  %v127_v29 = vld [vmem:[%s477_s3 + $0x30] sm:$0xff]  ;;  %v142_v30 = vld [vmem:[%s477_s3 + $0xa8] sm:$0xff] }
   0xf   :  { %260 = vmatpush3.msra.mxu1 %v131_v21  ;;  %v126_v31 = vld [vmem:[%s477_s3 + $0x28] sm:$0xff]  ;;  %v141_v32 = vld [vmem:[%s477_s3 + $0xa0] sm:$0xff]  ;;  %v140_v34 = vld [vmem:[%s477_s3 + $0x98] sm:$0xff]  ;;  %v34_v44 = vsub.s32 0, %v33_v43  ;;  %v38_v46 = vsub.s32 1, %v33_v43 }
  0x10   :  { %261 = vmatprep.subr.mxu1 %v146_v22  ;;  %v125_v33 = vld [vmem:[%s477_s3 + $0x20] sm:$0xff]  ;;  %v124_v35 = vld [vmem:[%s477_s3 + $0x18] sm:$0xff]  ;;  %v139_v36 = vld [vmem:[%s477_s3 + $0x90] sm:$0xff] }
  0x11   :  { %262 = vmatpush3.msra.mxu1 %v130_v23  ;;  %v123_v37 = vld [vmem:[%s477_s3 + $0x10] sm:$0xff]  ;;  %v138_v38 = vld [vmem:[%s477_s3 + $0x88] sm:$0xff]  ;;  %v137_v40 = vld [vmem:[%s477_s3 + $0x80] sm:$0xff] }
  0x12   :  { %263 = vmatprep.subr.mxu1 %v145_v24  ;;  %v122_v39 = vld [vmem:[%s477_s3 + $0x8] sm:$0xff]  ;;  %v121_v41 = vld [vmem:[%s477_s3] sm:$0xff] }
  0x13   :  { %264 = vmatpush3.msra.mxu1 %v129_v25  ;;  %v30_v45 = vld [vmem:[%s476_s2] sm:$0x3]  ;;  %s311_s2 = smov [#allocation2]  }
  0x14   :  { %265 = vmatprep.subr.mxu1 %v144_v26  ;;  %v35_v47 = vrot.slane %v30_v45, %v34_v44  ;;  %v39_v48 = vrot.slane %v30_v45, %v38_v46  ;;  %v248_v58 = vld [vmem:[%s478_s4] ss:$0 sm:$0xff]  ;;  %s239_s1 = sshll.u32 %s311_s2, 4  ;;  %s240_s1 = int_to_ptr.vmem [resolvable:$true] %s239_s1 }
  0x15   :  { %266 = vmatpush3.msra.mxu1 %v128_v27  ;;  %s288_s24 = scalar_lea.vmem %s240_s1, 128  ;;  %p293_p1 = scmp.lt.s32.totalorder %s240_s1, %s240_s1 }
  0x16   :  { %267 = vmatprep.subr.mxu1 %v143_v28  ;;  %p289_p0 = scmp.ne.s32.totalorder %s240_s1, %s288_s24  ;;  %p294_p2 = scmp.lt.s32.totalorder %s288_s24, %s288_s24 }
  0x17   :  { %268 = vmatpush3.msra.mxu1 %v127_v29 }
  0x18   :  { %269 = vmatprep.subr.mxu1 %v142_v30  ;;  %p295_p3 = por %p294_p2, %p293_p1 }
  0x19   :  { %270 = vmatpush3.msra.mxu1 %v126_v31 }
  0x1a   :  { %271 = vmatprep.subr.mxu1 %v141_v32  ;;  %p296_p4 = pnand %p295_p3, %p289_p0 }
  0x1b   :  { %272 = vmatpush3.msra.mxu1 %v125_v33 }
  0x1c   :  { %273 = vmatprep.subr.mxu1 %v140_v34 }
  0x1d   :  { %274 = vmatpush3.msra.mxu1 %v124_v35 }
  0x1e   :  { %275 = vmatprep.subr.mxu1 %v139_v36 }
  0x1f   :  { %276 = vmatpush3.msra.mxu1 %v123_v37 }
  0x20   :  { %277 = vmatprep.subr.mxu1 %v138_v38 }
  0x21   :  { %278 = vmatpush3.msra.mxu1 %v122_v39 }
  0x22   :  { %279 = vmatprep.subr.mxu1 %v137_v40 }
  0x23   :  { %280 = vmatpush3.msra.mxu1 %v121_v41 }
  0xca   :  { %v112_v49 = vpop.f32.mrf.mxu0 }
  0xcb   :  { %v113_v50 = vadd.f32 %v112_v49, %v35_v47 }
  0xcc   :  { %v114_v51 = vpop.f32.mrf.mxu0 }
  0xcd   :  { %v115_v52 = vadd.f32 %v114_v51, %v39_v48  ;;  %v117_v53 = vmul.f32 0.01, %v113_v50 }
  0xcf   :  { %v118_v54 = vmul.f32 0.01, %v115_v52  ;;  %v119_v56 = vmax.f32 %v113_v50, %v117_v53 }
  0xd1   :  { %v120_v55 = vmax.f32 %v115_v52, %v118_v54 }
  0xd3   :  { %224 = vmatprep.mubr.f32.mxu1 %v120_v55 }
  0xd4   :  { %225 = vmatmul.mubr.f32.vlgmr.msra.gmra.mxu1 %v119_v56 }
 0x194   :  { %v281_v57 = vpop.f32.mrf.mxu1 }
 0x196   :  { %v282_v59 = vpop.f32.mrf.mxu1 }
 0x197   :  { %v283_v60 = vadd.f32 %v282_v59, %v281_v57 }
 0x199   :  { %v227_v61 = vadd.f32 %v283_v60, %v248_v58 }
 0x19b   :  { %286 = vtanh.f32 %v227_v61 }
 0x1a8   :  { %v287_v62 = vpop.eup %286 }
 0x1a9   :  { %232 = vst.msk [vmem:[#allocation2] sm:$0xff] %vm231_vm1, %v287_v62 }
 0x1aa   :  { %299 = shalt.err (!%p296_p4)
}
 0x1ab   :  { %242 = dma.vmem_to_hbm [thread:$0]  %s240_s1, 128, %s479_s5, [#allocation3]  }
 0x1ac   :  { %308 = dma.done.wait [#allocation3], 128  }
 0x1ad   :  { %309 = vsyncadd [#allocation3], 4294967168 }
 0x1ae   :  { %246 = vsyncpa [#allocation3], 1 }

</bundles_post_ra>
